<compile_context>
chip_gen: v6e
topology: v6e:2x2x1
jax: 0.10.0
libtpu: 0.0.40
codegen_flags: <defaults>
</compile_context>

<pallas_src>
import functools

import jax
import jax.numpy as jnp
from jax.experimental import pallas as pl
from jax.experimental.pallas import tpu as pltpu

HIDDEN = 256
OUT_PAD = 128     # lane-dense padded width of the final layer / output
EPS = 1e-5


def _dnn_kernel(x_ref, d1_ref, d2_ref, d3_ref,
                w1_ref, b1_ref, g1_ref, be1_ref,
                w2_ref, b2_ref, g2_ref, be2_ref,
                w3_ref, b3_ref, g3_ref, be3_ref,
                w4_ref, b4_ref,
                out_ref):
    inv_b = jnp.float32(1.0 / x_ref.shape[0])

    def layer(h_bf16, w_ref, b_ref, g_ref, be_ref, d_ref):
        # Linear (bf16 x bf16 -> f32 accumulation on the MXU) + ReLU.
        z = jnp.dot(h_bf16, w_ref[...], preferred_element_type=jnp.float32) + b_ref[...]
        z = jnp.maximum(z, 0.0)
        # BatchNorm1d, training mode: single-pass batch stats (biased variance),
        # folded into a per-column affine z * scale + shift.
        s = jnp.sum(z, axis=0, keepdims=True)
        ss = jnp.sum(z * z, axis=0, keepdims=True)
        mean = s * inv_b
        var = jnp.maximum(ss * inv_b - mean * mean, 0.0)
        scale = g_ref[...] * jax.lax.rsqrt(var + EPS)
        shift = be_ref[...] - mean * scale
        z = z * scale + shift
        # Dropout p=0.5: d_ref holds precomputed inverted-dropout factors in {0, 2}.
        z = z * d_ref[...]
        return z.astype(jnp.bfloat16)

    h = x_ref[...].astype(jnp.bfloat16)
    h = layer(h, w1_ref, b1_ref, g1_ref, be1_ref, d1_ref)
    h = layer(h, w2_ref, b2_ref, g2_ref, be2_ref, d2_ref)
    h = layer(h, w3_ref, b3_ref, g3_ref, be3_ref, d3_ref)

    # Final Linear (padded to OUT_PAD lanes: padded columns have bias -1e30 so
    # their softmax weight underflows to exactly 0) + softmax over dim=1.
    logits = jnp.dot(h, w4_ref[...], preferred_element_type=jnp.float32) + b4_ref[...]
    m = jnp.max(logits, axis=1, keepdims=True)
    e = jnp.exp(logits - m)
    out_ref[...] = e / jnp.sum(e, axis=1, keepdims=True)


@functools.partial(jax.jit, static_argnames=("output_size",))
def simple_dnn_forward(dropout_key, x, params, output_size):
    B = x.shape[0]
    k1, k2, k3 = jax.random.split(dropout_key, 3)
    # Inverted dropout with keep-prob 0.5: kept elements are scaled by 2.
    d1 = jax.random.bernoulli(k1, 0.5, (B, HIDDEN)).astype(jnp.float32) * 2.0
    d2 = jax.random.bernoulli(k2, 0.5, (B, HIDDEN)).astype(jnp.float32) * 2.0
    d3 = jax.random.bernoulli(k3, 0.5, (B, HIDDEN)).astype(jnp.float32) * 2.0

    flat = [x, d1, d2, d3] + list(params)
    probs_padded = pl.pallas_call(
        _dnn_kernel,
        out_shape=jax.ShapeDtypeStruct((B, OUT_PAD), jnp.float32),
        in_specs=[pl.BlockSpec(memory_space=pltpu.MemorySpace.VMEM)] * len(flat),
        out_specs=pl.BlockSpec(memory_space=pltpu.MemorySpace.VMEM),
    )(*flat)
    # Slice the lane-dense padded output back to the real number of classes.
    return probs_padded[:, :output_size]


def init_params(key, input_size, output_size, hidden=HIDDEN):
    """Deterministic init matching SimpleDNN.__init__.

    Linear weights: kaiming_normal_ (fan_in mode, relu gain) -> std = sqrt(2/fan_in),
    stored transposed as [in, out] and cast to bf16 (matmul operand dtype).
    Biases: PyTorch Linear default U(-1/sqrt(fan_in), +1/sqrt(fan_in)), kept in f32.
    BatchNorm: gamma = 1, beta = 0 (f32, shaped (1, hidden)).
    The last layer is padded from output_size to OUT_PAD columns: padded weight
    columns are 0 and padded bias entries are -1e30 (zero softmax mass).
    """
    dims = [(input_size, hidden), (hidden, hidden), (hidden, hidden), (hidden, output_size)]
    keys = jax.random.split(key, 2 * len(dims))
    lin = []
    for i, (fan_in, fan_out) in enumerate(dims):
        std = (2.0 / fan_in) ** 0.5
        w = std * jax.random.normal(keys[2 * i], (fan_in, fan_out), jnp.float32)
        bound = 1.0 / (fan_in ** 0.5)
        b = jax.random.uniform(keys[2 * i + 1], (1, fan_out), jnp.float32, -bound, bound)
        lin.append((w, b))

    flat = []
    for i in range(3):
        w, b = lin[i]
        gamma = jnp.ones((1, hidden), jnp.float32)
        beta = jnp.zeros((1, hidden), jnp.float32)
        flat += [w.astype(jnp.bfloat16), b, gamma, beta]

    w4, b4 = lin[3]
    w4_pad = jnp.zeros((hidden, OUT_PAD), jnp.float32).at[:, :output_size].set(w4)
    b4_pad = jnp.full((1, OUT_PAD), -1e30, jnp.float32).at[:, :output_size].set(b4)
    flat += [w4_pad.astype(jnp.bfloat16), b4_pad]
    return tuple(flat)


if __name__ == "__main__":
    input_size = 16
    output_size = 4
    batch = 8

    key = jax.random.PRNGKey(0)
    k_x, k_p, k_drop = jax.random.split(key, 3)
    x = jax.random.normal(k_x, (batch, input_size), jnp.float32)
    params = init_params(k_p, input_size, output_size)

    probs = simple_dnn_forward(k_drop, x, params, output_size)
    probs = jax.block_until_ready(probs)

    assert probs.shape == (batch, output_size)
    # rows of the (sliced) softmax must sum to 1 and be non-negative
    assert bool(jnp.allclose(jnp.sum(probs, axis=1), 1.0, atol=1e-4))
    assert bool(jnp.all(probs >= 0.0))
    print("KERNEL_OK")
</pallas_src>

<mosaic_0001>
module attributes {stable_mosaic.version = 11 : i64} {
  func.func @_dnn_kernel(%arg0: memref<8x16xf32, #tpu.memory_space<vmem>>, %arg1: memref<8x256xf32, #tpu.memory_space<vmem>>, %arg2: memref<8x256xf32, #tpu.memory_space<vmem>>, %arg3: memref<8x256xf32, #tpu.memory_space<vmem>>, %arg4: memref<16x256xbf16, #tpu.memory_space<vmem>>, %arg5: memref<1x256xf32, #tpu.memory_space<vmem>>, %arg6: memref<1x256xf32, #tpu.memory_space<vmem>>, %arg7: memref<1x256xf32, #tpu.memory_space<vmem>>, %arg8: memref<256x256xbf16, #tpu.memory_space<vmem>>, %arg9: memref<1x256xf32, #tpu.memory_space<vmem>>, %arg10: memref<1x256xf32, #tpu.memory_space<vmem>>, %arg11: memref<1x256xf32, #tpu.memory_space<vmem>>, %arg12: memref<256x256xbf16, #tpu.memory_space<vmem>>, %arg13: memref<1x256xf32, #tpu.memory_space<vmem>>, %arg14: memref<1x256xf32, #tpu.memory_space<vmem>>, %arg15: memref<1x256xf32, #tpu.memory_space<vmem>>, %arg16: memref<256x128xbf16, #tpu.memory_space<vmem>>, %arg17: memref<1x128xf32, #tpu.memory_space<vmem>>, %arg18: memref<8x128xf32, #tpu.memory_space<vmem>>) attributes {dimension_semantics = [], scalar_prefetch = 0 : i64, scratch_operands = 0 : i64, tpu.core_type = #tpu.core_type<tc>} {
    %c0 = arith.constant 0 : index
    %c0_0 = arith.constant 0 : index
    %0 = vector.load %arg0[%c0, %c0_0] : memref<8x16xf32, #tpu.memory_space<vmem>>, vector<8x16xf32>
    %1 = arith.truncf %0 : vector<8x16xf32> to vector<8x16xbf16>
    %c0_1 = arith.constant 0 : index
    %c0_2 = arith.constant 0 : index
    %2 = vector.load %arg4[%c0_1, %c0_2] : memref<16x256xbf16, #tpu.memory_space<vmem>>, vector<16x256xbf16>
    %cst = arith.constant dense<0.000000e+00> : vector<8x256xf32>
    %3 = tpu.matmul %1, %2, %cst {dimension_numbers = #tpu.dot_dimension_numbers<[1], [0], [0], [1], [0, 0, 1, 1], [], []>} : vector<8x16xbf16>, vector<16x256xbf16>, vector<8x256xf32> -> vector<8x256xf32>
    %c0_3 = arith.constant 0 : index
    %c0_4 = arith.constant 0 : index
    %4 = vector.load %arg5[%c0_3, %c0_4] : memref<1x256xf32, #tpu.memory_space<vmem>>, vector<1x256xf32>
    %5 = vector.broadcast %4 : vector<1x256xf32> to vector<8x256xf32>
    %6 = arith.addf %3, %5 : vector<8x256xf32>
    %cst_5 = arith.constant 0.000000e+00 : f32
    %7 = vector.broadcast %cst_5 : f32 to vector<8x256xf32>
    %8 = arith.maximumf %6, %7 : vector<8x256xf32>
    %cst_6 = arith.constant dense<0.000000e+00> : vector<256xf32>
    %9 = vector.multi_reduction <add>, %8, %cst_6 [0] : vector<8x256xf32> to vector<256xf32>
    %10 = vector.shape_cast %9 : vector<256xf32> to vector<1x256xf32>
    %11 = arith.mulf %8, %8 : vector<8x256xf32>
    %cst_7 = arith.constant dense<0.000000e+00> : vector<256xf32>
    %12 = vector.multi_reduction <add>, %11, %cst_7 [0] : vector<8x256xf32> to vector<256xf32>
    %13 = vector.shape_cast %12 : vector<256xf32> to vector<1x256xf32>
    %cst_8 = arith.constant 1.250000e-01 : f32
    %14 = vector.broadcast %cst_8 : f32 to vector<1x256xf32>
    %15 = arith.mulf %10, %14 : vector<1x256xf32>
    %cst_9 = arith.constant 1.250000e-01 : f32
    %16 = vector.broadcast %cst_9 : f32 to vector<1x256xf32>
    %17 = arith.mulf %13, %16 : vector<1x256xf32>
    %18 = arith.mulf %15, %15 : vector<1x256xf32>
    %19 = arith.subf %17, %18 : vector<1x256xf32>
    %cst_10 = arith.constant 0.000000e+00 : f32
    %20 = vector.broadcast %cst_10 : f32 to vector<1x256xf32>
    %21 = arith.maximumf %19, %20 : vector<1x256xf32>
    %c0_11 = arith.constant 0 : index
    %c0_12 = arith.constant 0 : index
    %22 = vector.load %arg6[%c0_11, %c0_12] : memref<1x256xf32, #tpu.memory_space<vmem>>, vector<1x256xf32>
    %cst_13 = arith.constant 9.99999974E-6 : f32
    %23 = vector.broadcast %cst_13 : f32 to vector<1x256xf32>
    %24 = arith.addf %21, %23 : vector<1x256xf32>
    %25 = math.rsqrt %24 : vector<1x256xf32>
    %26 = arith.mulf %22, %25 : vector<1x256xf32>
    %c0_14 = arith.constant 0 : index
    %c0_15 = arith.constant 0 : index
    %27 = vector.load %arg7[%c0_14, %c0_15] : memref<1x256xf32, #tpu.memory_space<vmem>>, vector<1x256xf32>
    %28 = arith.mulf %15, %26 : vector<1x256xf32>
    %29 = arith.subf %27, %28 : vector<1x256xf32>
    %30 = vector.broadcast %26 : vector<1x256xf32> to vector<8x256xf32>
    %31 = arith.mulf %8, %30 : vector<8x256xf32>
    %32 = vector.broadcast %29 : vector<1x256xf32> to vector<8x256xf32>
    %33 = arith.addf %31, %32 : vector<8x256xf32>
    %c0_16 = arith.constant 0 : index
    %c0_17 = arith.constant 0 : index
    %34 = vector.load %arg1[%c0_16, %c0_17] : memref<8x256xf32, #tpu.memory_space<vmem>>, vector<8x256xf32>
    %35 = arith.mulf %33, %34 : vector<8x256xf32>
    %36 = arith.truncf %35 : vector<8x256xf32> to vector<8x256xbf16>
    %c0_18 = arith.constant 0 : index
    %c0_19 = arith.constant 0 : index
    %37 = vector.load %arg8[%c0_18, %c0_19] : memref<256x256xbf16, #tpu.memory_space<vmem>>, vector<256x256xbf16>
    %cst_20 = arith.constant dense<0.000000e+00> : vector<8x256xf32>
    %38 = tpu.matmul %36, %37, %cst_20 {dimension_numbers = #tpu.dot_dimension_numbers<[1], [0], [0], [1], [0, 0, 1, 1], [], []>} : vector<8x256xbf16>, vector<256x256xbf16>, vector<8x256xf32> -> vector<8x256xf32>
    %c0_21 = arith.constant 0 : index
    %c0_22 = arith.constant 0 : index
    %39 = vector.load %arg9[%c0_21, %c0_22] : memref<1x256xf32, #tpu.memory_space<vmem>>, vector<1x256xf32>
    %40 = vector.broadcast %39 : vector<1x256xf32> to vector<8x256xf32>
    %41 = arith.addf %38, %40 : vector<8x256xf32>
    %cst_23 = arith.constant 0.000000e+00 : f32
    %42 = vector.broadcast %cst_23 : f32 to vector<8x256xf32>
    %43 = arith.maximumf %41, %42 : vector<8x256xf32>
    %cst_24 = arith.constant dense<0.000000e+00> : vector<256xf32>
    %44 = vector.multi_reduction <add>, %43, %cst_24 [0] : vector<8x256xf32> to vector<256xf32>
    %45 = vector.shape_cast %44 : vector<256xf32> to vector<1x256xf32>
    %46 = arith.mulf %43, %43 : vector<8x256xf32>
    %cst_25 = arith.constant dense<0.000000e+00> : vector<256xf32>
    %47 = vector.multi_reduction <add>, %46, %cst_25 [0] : vector<8x256xf32> to vector<256xf32>
    %48 = vector.shape_cast %47 : vector<256xf32> to vector<1x256xf32>
    %cst_26 = arith.constant 1.250000e-01 : f32
    %49 = vector.broadcast %cst_26 : f32 to vector<1x256xf32>
    %50 = arith.mulf %45, %49 : vector<1x256xf32>
    %cst_27 = arith.constant 1.250000e-01 : f32
    %51 = vector.broadcast %cst_27 : f32 to vector<1x256xf32>
    %52 = arith.mulf %48, %51 : vector<1x256xf32>
    %53 = arith.mulf %50, %50 : vector<1x256xf32>
    %54 = arith.subf %52, %53 : vector<1x256xf32>
    %cst_28 = arith.constant 0.000000e+00 : f32
    %55 = vector.broadcast %cst_28 : f32 to vector<1x256xf32>
    %56 = arith.maximumf %54, %55 : vector<1x256xf32>
    %c0_29 = arith.constant 0 : index
    %c0_30 = arith.constant 0 : index
    %57 = vector.load %arg10[%c0_29, %c0_30] : memref<1x256xf32, #tpu.memory_space<vmem>>, vector<1x256xf32>
    %cst_31 = arith.constant 9.99999974E-6 : f32
    %58 = vector.broadcast %cst_31 : f32 to vector<1x256xf32>
    %59 = arith.addf %56, %58 : vector<1x256xf32>
    %60 = math.rsqrt %59 : vector<1x256xf32>
    %61 = arith.mulf %57, %60 : vector<1x256xf32>
    %c0_32 = arith.constant 0 : index
    %c0_33 = arith.constant 0 : index
    %62 = vector.load %arg11[%c0_32, %c0_33] : memref<1x256xf32, #tpu.memory_space<vmem>>, vector<1x256xf32>
    %63 = arith.mulf %50, %61 : vector<1x256xf32>
    %64 = arith.subf %62, %63 : vector<1x256xf32>
    %65 = vector.broadcast %61 : vector<1x256xf32> to vector<8x256xf32>
    %66 = arith.mulf %43, %65 : vector<8x256xf32>
    %67 = vector.broadcast %64 : vector<1x256xf32> to vector<8x256xf32>
    %68 = arith.addf %66, %67 : vector<8x256xf32>
    %c0_34 = arith.constant 0 : index
    %c0_35 = arith.constant 0 : index
    %69 = vector.load %arg2[%c0_34, %c0_35] : memref<8x256xf32, #tpu.memory_space<vmem>>, vector<8x256xf32>
    %70 = arith.mulf %68, %69 : vector<8x256xf32>
    %71 = arith.truncf %70 : vector<8x256xf32> to vector<8x256xbf16>
    %c0_36 = arith.constant 0 : index
    %c0_37 = arith.constant 0 : index
    %72 = vector.load %arg12[%c0_36, %c0_37] : memref<256x256xbf16, #tpu.memory_space<vmem>>, vector<256x256xbf16>
    %cst_38 = arith.constant dense<0.000000e+00> : vector<8x256xf32>
    %73 = tpu.matmul %71, %72, %cst_38 {dimension_numbers = #tpu.dot_dimension_numbers<[1], [0], [0], [1], [0, 0, 1, 1], [], []>} : vector<8x256xbf16>, vector<256x256xbf16>, vector<8x256xf32> -> vector<8x256xf32>
    %c0_39 = arith.constant 0 : index
    %c0_40 = arith.constant 0 : index
    %74 = vector.load %arg13[%c0_39, %c0_40] : memref<1x256xf32, #tpu.memory_space<vmem>>, vector<1x256xf32>
    %75 = vector.broadcast %74 : vector<1x256xf32> to vector<8x256xf32>
    %76 = arith.addf %73, %75 : vector<8x256xf32>
    %cst_41 = arith.constant 0.000000e+00 : f32
    %77 = vector.broadcast %cst_41 : f32 to vector<8x256xf32>
    %78 = arith.maximumf %76, %77 : vector<8x256xf32>
    %cst_42 = arith.constant dense<0.000000e+00> : vector<256xf32>
    %79 = vector.multi_reduction <add>, %78, %cst_42 [0] : vector<8x256xf32> to vector<256xf32>
    %80 = vector.shape_cast %79 : vector<256xf32> to vector<1x256xf32>
    %81 = arith.mulf %78, %78 : vector<8x256xf32>
    %cst_43 = arith.constant dense<0.000000e+00> : vector<256xf32>
    %82 = vector.multi_reduction <add>, %81, %cst_43 [0] : vector<8x256xf32> to vector<256xf32>
    %83 = vector.shape_cast %82 : vector<256xf32> to vector<1x256xf32>
    %cst_44 = arith.constant 1.250000e-01 : f32
    %84 = vector.broadcast %cst_44 : f32 to vector<1x256xf32>
    %85 = arith.mulf %80, %84 : vector<1x256xf32>
    %cst_45 = arith.constant 1.250000e-01 : f32
    %86 = vector.broadcast %cst_45 : f32 to vector<1x256xf32>
    %87 = arith.mulf %83, %86 : vector<1x256xf32>
    %88 = arith.mulf %85, %85 : vector<1x256xf32>
    %89 = arith.subf %87, %88 : vector<1x256xf32>
    %cst_46 = arith.constant 0.000000e+00 : f32
    %90 = vector.broadcast %cst_46 : f32 to vector<1x256xf32>
    %91 = arith.maximumf %89, %90 : vector<1x256xf32>
    %c0_47 = arith.constant 0 : index
    %c0_48 = arith.constant 0 : index
    %92 = vector.load %arg14[%c0_47, %c0_48] : memref<1x256xf32, #tpu.memory_space<vmem>>, vector<1x256xf32>
    %cst_49 = arith.constant 9.99999974E-6 : f32
    %93 = vector.broadcast %cst_49 : f32 to vector<1x256xf32>
    %94 = arith.addf %91, %93 : vector<1x256xf32>
    %95 = math.rsqrt %94 : vector<1x256xf32>
    %96 = arith.mulf %92, %95 : vector<1x256xf32>
    %c0_50 = arith.constant 0 : index
    %c0_51 = arith.constant 0 : index
    %97 = vector.load %arg15[%c0_50, %c0_51] : memref<1x256xf32, #tpu.memory_space<vmem>>, vector<1x256xf32>
    %98 = arith.mulf %85, %96 : vector<1x256xf32>
    %99 = arith.subf %97, %98 : vector<1x256xf32>
    %100 = vector.broadcast %96 : vector<1x256xf32> to vector<8x256xf32>
    %101 = arith.mulf %78, %100 : vector<8x256xf32>
    %102 = vector.broadcast %99 : vector<1x256xf32> to vector<8x256xf32>
    %103 = arith.addf %101, %102 : vector<8x256xf32>
    %c0_52 = arith.constant 0 : index
    %c0_53 = arith.constant 0 : index
    %104 = vector.load %arg3[%c0_52, %c0_53] : memref<8x256xf32, #tpu.memory_space<vmem>>, vector<8x256xf32>
    %105 = arith.mulf %103, %104 : vector<8x256xf32>
    %106 = arith.truncf %105 : vector<8x256xf32> to vector<8x256xbf16>
    %c0_54 = arith.constant 0 : index
    %c0_55 = arith.constant 0 : index
    %107 = vector.load %arg16[%c0_54, %c0_55] : memref<256x128xbf16, #tpu.memory_space<vmem>>, vector<256x128xbf16>
    %cst_56 = arith.constant dense<0.000000e+00> : vector<8x128xf32>
    %108 = tpu.matmul %106, %107, %cst_56 {dimension_numbers = #tpu.dot_dimension_numbers<[1], [0], [0], [1], [0, 0, 1, 1], [], []>} : vector<8x256xbf16>, vector<256x128xbf16>, vector<8x128xf32> -> vector<8x128xf32>
    %c0_57 = arith.constant 0 : index
    %c0_58 = arith.constant 0 : index
    %109 = vector.load %arg17[%c0_57, %c0_58] : memref<1x128xf32, #tpu.memory_space<vmem>>, vector<1x128xf32>
    %110 = vector.broadcast %109 : vector<1x128xf32> to vector<8x128xf32>
    %111 = arith.addf %108, %110 : vector<8x128xf32>
    %cst_59 = arith.constant dense<0xFF800000> : vector<8xf32>
    %112 = vector.multi_reduction <maximumf>, %111, %cst_59 [1] : vector<8x128xf32> to vector<8xf32>
    %113 = vector.shape_cast %112 : vector<8xf32> to vector<8x1xf32>
    %114 = vector.broadcast %113 : vector<8x1xf32> to vector<8x128xf32>
    %115 = arith.subf %111, %114 : vector<8x128xf32>
    %116 = math.exp %115 : vector<8x128xf32>
    %cst_60 = arith.constant dense<0.000000e+00> : vector<8xf32>
    %117 = vector.multi_reduction <add>, %116, %cst_60 [1] : vector<8x128xf32> to vector<8xf32>
    %118 = vector.shape_cast %117 : vector<8xf32> to vector<8x1xf32>
    %119 = vector.broadcast %118 : vector<8x1xf32> to vector<8x128xf32>
    %120 = arith.divf %116, %119 : vector<8x128xf32>
    %c0_61 = arith.constant 0 : index
    %c0_62 = arith.constant 0 : index
    %121 = vector.load %arg18[%c0_61, %c0_62] : memref<8x128xf32, #tpu.memory_space<vmem>>, vector<8x128xf32>
    tpu.vector_store %arg18[%c0_61, %c0_62], %120 {strides = array<i32>} : memref<8x128xf32, #tpu.memory_space<vmem>>, vector<8x128xf32>,
    return
  }
}

</mosaic_0001>

<bundles_post_ra>
// kernel: simple_dnn_forward.3
= control target key start
LH: loop header
LB: loop body
LE: loop exit
PB: predicated region body
PF: predicated region fallthrough
CT: control target
= control target key end

     0   :  { %s1747_s0 = inlined_call_operand.vmem [shape: f32[8,16], index: 0, kind: input, shape index: {}]   ;;  %s1748_s1 = inlined_call_operand.vmem [shape: f32[8,256], index: 1, kind: input, shape index: {}]   ;;  %s1749_s2 = inlined_call_operand.vmem [shape: f32[8,256], index: 2, kind: input, shape index: {}]   ;;  %s1750_s3 = inlined_call_operand.vmem [shape: f32[8,256], index: 3, kind: input, shape index: {}]   ;;  %s1751_s4 = inlined_call_operand.vmem [shape: bf16[16,256], index: 4, kind: input, shape index: {}]   ;;  %s1752_s5 = inlined_call_operand.vmem [shape: f32[1,256], index: 5, kind: input, shape index: {}]   ;;  %s1753_s6 = inlined_call_operand.vmem [shape: f32[1,256], index: 6, kind: input, shape index: {}]   ;;  %s1754_s7 = inlined_call_operand.vmem [shape: f32[1,256], index: 7, kind: input, shape index: {}]   ;;  %s1755_s8 = inlined_call_operand.hbm [shape: bf16[256,256], index: 8, kind: input, shape index: {}]   ;;  %s1756_s9 = inlined_call_operand.vmem [shape: f32[1,256], index: 9, kind: input, shape index: {}]   ;;  %s1757_s10 = inlined_call_operand.vmem [shape: f32[1,256], index: 10, kind: input, shape index: {}]   ;;  %s1758_s11 = inlined_call_operand.vmem [shape: f32[1,256], index: 11, kind: input, shape index: {}]   ;;  %s1759_s12 = inlined_call_operand.hbm [shape: bf16[256,256], index: 12, kind: input, shape index: {}]   ;;  %s1760_s13 = inlined_call_operand.vmem [shape: f32[1,256], index: 13, kind: input, shape index: {}]   ;;  %s1761_s14 = inlined_call_operand.vmem [shape: f32[1,256], index: 14, kind: input, shape index: {}]   ;;  %s1762_s15 = inlined_call_operand.vmem [shape: f32[1,256], index: 15, kind: input, shape index: {}]   ;;  %s1763_s16 = inlined_call_operand.vmem [shape: bf16[256,128], index: 16, kind: input, shape index: {}]   ;;  %s1764_s17 = inlined_call_operand.vmem [shape: f32[1,128], index: 17, kind: input, shape index: {}]   ;;  %s1765_s18 = inlined_call_operand.vmem [shape: f32[8,128], index: 18, kind: output, shape index: {}]  }
   0x1   :  { %1768 = sst [smem:[#allocation8_spill]] %s1747_s0 }
   0x2   :  { %1769 = sst [smem:[#allocation9_spill]] %s1748_s1 }
   0x3   :  { %1770 = sst [smem:[#allocation10_spill]] %s1749_s2 }
   0x4   :  { %23 = vsyncpa [#allocation3], 0 }
   0x5   :  { %24 = vsyncpa [#allocation5], 0  ;;  %s1475_s27 = smov [#allocation2]  }
   0x6   :  { %s46_s28 = sshll.u32 %s1475_s27, 4  ;;  %s47_s28 = int_to_ptr.vmem [resolvable:$true] %s46_s28 }
   0x7   :  { %s1439_s29 = scalar_lea.vmem %s47_s28, 4096  ;;  %p1444_p1 = scmp.lt.s32.totalorder %s47_s28, %s47_s28 }
   0x8   :  { %p1440_p0 = scmp.ne.s32.totalorder %s47_s28, %s1439_s29  ;;  %p1445_p2 = scmp.lt.s32.totalorder %s1439_s29, %s1439_s29 }
   0xa   :  { %p1446_p3 = por %p1445_p2, %p1444_p1 }
   0xc   :  { %p1447_p4 = pnand %p1446_p3, %p1440_p0 }
   0xe   :  { %1450 = shalt.err (!%p1447_p4)
}
   0xf   :  { %s1476_s30 = smov 128   ;;  %s1477_s0 = smov 8  }
  0x10   :  { %52 = dma.hbm_to_vmem [thread:$0]  %s1755_s8, 4096, %s47_s28, [#allocation3], %s1476_s30, %s1476_s30, %s1477_s0  }
  0x11   :  { %s1478_s20 = smov [#allocation4]  }
  0x12   :  { %s64_s21 = sshll.u32 %s1478_s20, 4  ;;  %s65_s21 = int_to_ptr.vmem [resolvable:$true] %s64_s21 }
  0x13   :  { %s1459_s22 = scalar_lea.vmem %s65_s21, 4096  ;;  %p1464_p6 = scmp.lt.s32.totalorder %s65_s21, %s65_s21 }
  0x14   :  { %p1460_p5 = scmp.ne.s32.totalorder %s65_s21, %s1459_s22  ;;  %p1465_p7 = scmp.lt.s32.totalorder %s1459_s22, %s1459_s22 }
  0x16   :  { %p1466_p8 = por %p1465_p7, %p1464_p6 }
  0x18   :  { %p1467_p9 = pnand %p1466_p8, %p1460_p5 }
  0x1a   :  { %1470 = shalt.err (!%p1467_p9)
}
  0x1b   :  { %70 = dma.hbm_to_vmem [thread:$0]  %s1759_s12, 4096, %s65_s21, [#allocation5], %s1476_s30, %s1476_s30, %s1477_s0  }
  0x1c   :  { %1471 = dma.done.wait [#allocation3], 4096  }
  0x1d   :  { %1472 = vsyncadd [#allocation3], 4294963200 }
  0x1e   :  { %1473 = dma.done.wait [#allocation5], 4096  }
  0x1f   :  { %1474 = vsyncadd [#allocation5], 4294963200  ;;  %v1479_v0 = vmov 0   ;;  %v1300_v1 = vld [vmem:[%s1751_s4 + $0x4] ss:$8 sps:$4 sm:$0xff]   ;;  %s1771_s29 = sld [smem:[#allocation8_spill]]  ;;  %v94_v37 = vlaneseq }
  0x20   :  { %150 = vmatprep.mubr.bf16.mxu0 %v1479_v0  ;;  %v1302_v2 = vld [vmem:[%s1751_s4] ss:$8 sps:$4 sm:$0xff]   ;;  %132 = vmatprep.subr.bf16.mxu0 %v1300_v1  ;;  %vm114_vm0 = vcmask 130048   ;;  %v1303_v5 = vld [vmem:[#allocation2 + $0x74] ss:$8 sps:$4 sm:$0xff]   ;;  %s1772_s20 = sld [smem:[#allocation9_spill]] }
  0x21   :  { %133 = vmatpush1.bf16.msra.mxu0 %v1302_v2  ;;  %v1305_v6 = vld [vmem:[#allocation2 + $0x70] ss:$8 sps:$4 sm:$0xff]   ;;  %479 = vmatprep.subr.bf16.mxu1 %v1303_v5  ;;  %v1306_v7 = vld [vmem:[#allocation2 + $0x64] ss:$8 sps:$4 sm:$0xff]   ;;  %v1308_v8 = vld [vmem:[#allocation2 + $0x60] ss:$8 sps:$4 sm:$0xff]  }
  0x22   :  { %480 = vmatpush1.bf16.msra.mxu1 %v1305_v6  ;;  %v1309_v9 = vld [vmem:[#allocation2 + $0x54] ss:$8 sps:$4 sm:$0xff]   ;;  %v1311_v10 = vld [vmem:[#allocation2 + $0x50] ss:$8 sps:$4 sm:$0xff]   ;;  %v1312_v11 = vld [vmem:[#allocation2 + $0x44] ss:$8 sps:$4 sm:$0xff]  }
  0x23   :  { %481 = vmatprep.subr.bf16.mxu1 %v1306_v7  ;;  %v1314_v12 = vld [vmem:[#allocation2 + $0x40] ss:$8 sps:$4 sm:$0xff]   ;;  %v1315_v13 = vld [vmem:[#allocation2 + $0x34] ss:$8 sps:$4 sm:$0xff]   ;;  %v1317_v14 = vld [vmem:[#allocation2 + $0x30] ss:$8 sps:$4 sm:$0xff]  }
  0x24   :  { %v1318_v15 = vld [vmem:[#allocation2 + $0x24] ss:$8 sps:$4 sm:$0xff]   ;;  %v1320_v16 = vld [vmem:[#allocation2 + $0x20] ss:$8 sps:$4 sm:$0xff]   ;;  %v1321_v17 = vld [vmem:[#allocation2 + $0x14] ss:$8 sps:$4 sm:$0xff]  }
  0x25   :  { %v88_v3 = vld [vmem:[%s1771_s29] sm:$0xff]  ;;  %v1323_v18 = vld [vmem:[#allocation2 + $0x10] ss:$8 sps:$4 sm:$0xff]   ;;  %v1327_v21 = vld [vmem:[#allocation2 + $0xf4] ss:$8 sps:$4 sm:$0xff]   ;;  %v95_v38 = vshrl.u32 %v94_v37, 7 }
  0x26   :  { %v89_v4 = vpack.c.bf16 %v88_v3, %v88_v3  ;;  %482 = vmatpush1.bf16.msra.mxu1 %v1308_v8  ;;  %v1324_v19 = vld [vmem:[#allocation2 + $0x4] ss:$8 sps:$4 sm:$0xff]   ;;  %v1326_v20 = vld [vmem:[#allocation2] ss:$8 sps:$4 sm:$0xff]   ;;  %v1329_v22 = vld [vmem:[#allocation2 + $0xf0] ss:$8 sps:$4 sm:$0xff]  }
  0x27   :  { %483 = vmatprep.subr.bf16.mxu1 %v1309_v9  ;;  %v1330_v23 = vld [vmem:[#allocation2 + $0xe4] ss:$8 sps:$4 sm:$0xff]   ;;  %v1332_v24 = vld [vmem:[#allocation2 + $0xe0] ss:$8 sps:$4 sm:$0xff]   ;;  %v1333_v25 = vld [vmem:[#allocation2 + $0xd4] ss:$8 sps:$4 sm:$0xff]  }
  0x28   :  { %1190 = vmatmul.mubr.msk.bf16.vlgmr.msra.gmra.mxu0 %vm114_vm0, %v89_v4  ;;  %v1335_v26 = vld [vmem:[#allocation2 + $0xd0] ss:$8 sps:$4 sm:$0xff]   ;;  %v1336_v27 = vld [vmem:[#allocation2 + $0xc4] ss:$8 sps:$4 sm:$0xff]   ;;  %v1338_v28 = vld [vmem:[#allocation2 + $0xc0] ss:$8 sps:$4 sm:$0xff]  }
  0x29   :  { %v1339_v29 = vld [vmem:[#allocation2 + $0xb4] ss:$8 sps:$4 sm:$0xff]   ;;  %v1341_v30 = vld [vmem:[#allocation2 + $0xb0] ss:$8 sps:$4 sm:$0xff]   ;;  %v1342_v31 = vld [vmem:[#allocation2 + $0xa4] ss:$8 sps:$4 sm:$0xff]  }
  0x2a   :  { %484 = vmatpush1.bf16.msra.mxu1 %v1311_v10  ;;  %v1344_v32 = vld [vmem:[#allocation2 + $0xa0] ss:$8 sps:$4 sm:$0xff]   ;;  %v1345_v33 = vld [vmem:[#allocation2 + $0x94] ss:$8 sps:$4 sm:$0xff]   ;;  %v1347_v34 = vld [vmem:[#allocation2 + $0x90] ss:$8 sps:$4 sm:$0xff]  }
  0x2b   :  { %485 = vmatprep.subr.bf16.mxu1 %v1312_v11  ;;  %v1348_v35 = vld [vmem:[#allocation2 + $0x84] ss:$8 sps:$4 sm:$0xff]   ;;  %v1350_v36 = vld [vmem:[#allocation2 + $0x80] ss:$8 sps:$4 sm:$0xff]   ;;  %v1591_v39 = vsub.s32 0, %v95_v38  ;;  %v1596_v41 = vsub.s32 1, %v95_v38 }
  0x2c   :  { %v92_v40 = vld [vmem:[%s1752_s5] sm:$0x3]  ;;  %s1773_s26 = sld [smem:[#allocation10_spill]] }
  0x2d   :  { %v97_v42 = vrot.slane %v92_v40, %v1591_v39  ;;  %v101_v43 = vrot.slane %v92_v40, %v1596_v41 }
  0x2e   :  { %486 = vmatpush1.bf16.msra.mxu1 %v1314_v12 }
  0x2f   :  { %487 = vmatprep.subr.bf16.mxu1 %v1315_v13 }
  0x32   :  { %488 = vmatpush1.bf16.msra.mxu1 %v1317_v14 }
  0x33   :  { %489 = vmatprep.subr.bf16.mxu1 %v1318_v15 }
  0x36   :  { %490 = vmatpush1.bf16.msra.mxu1 %v1320_v16 }
  0x37   :  { %491 = vmatprep.subr.bf16.mxu1 %v1321_v17 }
  0x3a   :  { %492 = vmatpush1.bf16.msra.mxu1 %v1323_v18 }
  0x3b   :  { %493 = vmatprep.subr.bf16.mxu1 %v1324_v19 }
  0x3e   :  { %494 = vmatpush1.bf16.msra.mxu1 %v1326_v20 }
  0x3f   :  { %495 = vmatprep.subr.bf16.mxu1 %v1327_v21 }
  0x42   :  { %496 = vmatpush2.bf16.msra.mxu1 %v1329_v22 }
  0x43   :  { %497 = vmatprep.subr.bf16.mxu1 %v1330_v23 }
  0x46   :  { %498 = vmatpush2.bf16.msra.mxu1 %v1332_v24 }
  0x47   :  { %499 = vmatprep.subr.bf16.mxu1 %v1333_v25 }
  0x4a   :  { %500 = vmatpush2.bf16.msra.mxu1 %v1335_v26  ;;  %v1480_v26 = vmov 1966171168  }
  0x4b   :  { %501 = vmatprep.subr.bf16.mxu1 %v1336_v27  ;;  %v206_v27 = vunpack.c.l.s4 %v1480_v26  ;;  %v1398_v26 = vld [vmem:[#allocation4 + $0x84] ss:$8 sps:$4 sm:$0xff]  }
  0x4e   :  { %502 = vmatpush2.bf16.msra.mxu1 %v1338_v28  ;;  %v207_v28 = vunpack.c.0.s8 %v206_v27  ;;  %v1396_v27 = vld [vmem:[#allocation4 + $0x80] ss:$8 sps:$4 sm:$0xff]  }
  0x4f   :  { %503 = vmatprep.subr.bf16.mxu1 %v1339_v29 }
  0x52   :  { %504 = vmatpush2.bf16.msra.mxu1 %v1341_v30  ;;  %v1606_v30 = vsub.s32 %v207_v28, %v95_v38  ;;  %v307_v28 = vld [vmem:[%s1756_s9] sm:$0x3] }
  0x53   :  { %505 = vmatprep.subr.bf16.mxu1 %v1342_v31 }
  0x56   :  { %506 = vmatpush2.bf16.msra.mxu1 %v1344_v32 }
  0x57   :  { %507 = vmatprep.subr.bf16.mxu1 %v1345_v33 }
  0x5a   :  { %508 = vmatpush2.bf16.msra.mxu1 %v1347_v34  ;;  %v197_v34 = vld [vmem:[%s1753_s6] sm:$0x3] }
  0x5b   :  { %509 = vmatprep.subr.bf16.mxu1 %v1348_v35 }
  0x5e   :  { %510 = vmatpush2.bf16.msra.mxu1 %v1350_v36 }
  0xe8   :  { %v152_v44 = vpop.f32.mrf.mxu0 }
  0xe9   :  { %v153_v45 = vadd.f32 %v152_v44, %v97_v42 }
  0xea   :  { %v154_v46 = vpop.f32.mrf.mxu0 }
  0xeb   :  { %v1600_v47 = vmax.f32 %v153_v45, 0.0  ;;  %v155_v48 = vadd.f32 %v154_v46, %v101_v43  ;;  %v221_v45 = vld [vmem:[%s1754_s7] sm:$0x3] }
  0xec   :  { %v156_v49 = vpop.f32.mrf.mxu0 }
  0xed   :  { %v161_v50 = vrot.slane %v1600_v47, 4  ;;  %v173_v51 = vmul.f32 %v1600_v47, %v1600_v47  ;;  %v160_v52 = vmax.f32 %v155_v48, 0.0 }
  0xee   :  { %v157_v53 = vpop.f32.mrf.mxu0 }
  0xef   :  { %v162_v54 = vadd.f32 %v161_v50, %v1600_v47  ;;  %v175_v55 = vrot.slane %v173_v51, 4  ;;  %v167_v56 = vrot.slane %v160_v52, 4  ;;  %v174_v57 = vmul.f32 %v160_v52, %v160_v52 }
  0xf1   :  { %v163_v58 = vrot.slane %v162_v54, 2  ;;  %v176_v59 = vadd.f32 %v175_v55, %v173_v51  ;;  %v168_v60 = vadd.f32 %v167_v56, %v160_v52  ;;  %v181_v61 = vrot.slane %v174_v57, 4  ;;  %v269_v55 = vld [vmem:[%s1772_s20] sm:$0xff] }
  0xf3   :  { %v164_v62 = vadd.f32 %v163_v58, %v162_v54  ;;  %v177_v63 = vrot.slane %v176_v59, 2  ;;  %v169_v0 = vrot.slane %v168_v60, 2  ;;  %v182_v1 = vadd.f32 %v181_v61, %v174_v57  ;;  %v270_v54 = vld [vmem:[%s1772_s20 + $0x8] sm:$0xff]  ;;  %v1353_v61 = vld [vmem:[#allocation4 + $0x74] ss:$8 sps:$4 sm:$0xff]  }
  0xf4   :  { %840 = vmatprep.subr.bf16.mxu0 %v1353_v61 }
  0xf5   :  { %v165_v2 = vrot.slane %v164_v62, 1  ;;  %v178_v3 = vadd.f32 %v177_v63, %v176_v59  ;;  %v170_v4 = vadd.f32 %v169_v0, %v168_v60  ;;  %v183_v5 = vrot.slane %v182_v1, 2  ;;  %v1354_v63 = vld [vmem:[#allocation4 + $0x60] ss:$8 sps:$4 sm:$0xff]   ;;  %v1359_v0 = vld [vmem:[#allocation4 + $0x54] ss:$8 sps:$4 sm:$0xff]  }
  0xf7   :  { %v166_v6 = vadd.f32 %v165_v2, %v164_v62  ;;  %v179_v7 = vrot.slane %v178_v3, 1  ;;  %v184_v8 = vadd.f32 %v183_v5, %v182_v1  ;;  %v171_v9 = vrot.slane %v170_v4, 1  ;;  %v1356_v62 = vld [vmem:[#allocation4 + $0x64] ss:$8 sps:$4 sm:$0xff]   ;;  %v1357_v1 = vld [vmem:[#allocation4 + $0x50] ss:$8 sps:$4 sm:$0xff]  }
  0xf8   :  { %v1362_v2 = vld [vmem:[#allocation4 + $0x44] ss:$8 sps:$4 sm:$0xff]   ;;  %v1363_v5 = vld [vmem:[#allocation4 + $0x30] ss:$8 sps:$4 sm:$0xff]  }
  0xf9   :  { %v180_v10 = vadd.f32 %v179_v7, %v178_v3  ;;  %v187_v11 = vmul.f32 0.125, %v166_v6  ;;  %v185_v12 = vrot.slane %v184_v8, 1  ;;  %v172_v13 = vadd.f32 %v171_v9, %v170_v4  ;;  %v1360_v3 = vld [vmem:[#allocation4 + $0x40] ss:$8 sps:$4 sm:$0xff]   ;;  %v1365_v4 = vld [vmem:[#allocation4 + $0x34] ss:$8 sps:$4 sm:$0xff]  }
  0xfa   :  { %v1368_v6 = vld [vmem:[#allocation4 + $0x24] ss:$8 sps:$4 sm:$0xff]   ;;  %v1366_v7 = vld [vmem:[#allocation4 + $0x20] ss:$8 sps:$4 sm:$0xff]   ;;  %v1371_v9 = vld [vmem:[#allocation4 + $0x14] ss:$8 sps:$4 sm:$0xff]  }
  0xfb   :  { %v189_v14 = vmul.f32 0.125, %v180_v10  ;;  %v191_v15 = vmul.f32 %v187_v11, %v187_v11  ;;  %v186_v16 = vadd.f32 %v185_v12, %v184_v8  ;;  %v188_v17 = vmul.f32 0.125, %v172_v13  ;;  %v1369_v8 = vld [vmem:[#allocation4 + $0x10] ss:$8 sps:$4 sm:$0xff]   ;;  %v1374_v10 = vld [vmem:[#allocation4 + $0x4] ss:$8 sps:$4 sm:$0xff]  }
  0xfc   :  { %v1377_v12 = vld [vmem:[#allocation4 + $0xf4] ss:$8 sps:$4 sm:$0xff]   ;;  %v1375_v13 = vld [vmem:[#allocation4 + $0xf0] ss:$8 sps:$4 sm:$0xff]  }
  0xfd   :  { %v193_v18 = vsub.f32 %v189_v14, %v191_v15  ;;  %v190_v19 = vmul.f32 0.125, %v186_v16  ;;  %v192_v20 = vmul.f32 %v188_v17, %v188_v17  ;;  %v1380_v14 = vld [vmem:[#allocation4 + $0xe4] ss:$8 sps:$4 sm:$0xff]   ;;  %v1378_v15 = vld [vmem:[#allocation4 + $0xe0] ss:$8 sps:$4 sm:$0xff]  }
  0xfe   :  { %v1383_v16 = vld [vmem:[#allocation4 + $0xd4] ss:$8 sps:$4 sm:$0xff]  }
  0xff   :  { %v195_v21 = vmax.f32 %v193_v18, 0.0  ;;  %v194_v22 = vsub.f32 %v190_v19, %v192_v20  ;;  %v1386_v18 = vld [vmem:[#allocation4 + $0xc4] ss:$8 sps:$4 sm:$0xff]   ;;  %v1384_v19 = vld [vmem:[#allocation4 + $0xc0] ss:$8 sps:$4 sm:$0xff]  }
 0x100   :  { %v1389_v20 = vld [vmem:[#allocation4 + $0xb4] ss:$8 sps:$4 sm:$0xff]  }
 0x101   :  { %v198_v23 = vadd.f32 1e-05, %v195_v21  ;;  %v196_v24 = vmax.f32 %v194_v22, 0.0  ;;  %v1387_v21 = vld [vmem:[#allocation4 + $0xb0] ss:$8 sps:$4 sm:$0xff]  }
 0x102   :  { %v1392_v22 = vld [vmem:[#allocation4 + $0xa4] ss:$8 sps:$4 sm:$0xff]  }
 0x103   :  { %v199_v25 = vadd.f32 1e-05, %v196_v24  ;;  %1415 = vrsqrt.f32 %v198_v23  ;;  %v1390_v23 = vld [vmem:[#allocation4 + $0xa0] ss:$8 sps:$4 sm:$0xff]   ;;  %v1395_v24 = vld [vmem:[#allocation4 + $0x94] ss:$8 sps:$4 sm:$0xff]  }
 0x105   :  { %1417 = vrsqrt.f32 %v199_v25  ;;  %v1393_v25 = vld [vmem:[#allocation4 + $0x90] ss:$8 sps:$4 sm:$0xff]  }
 0x110   :  { %v1416_v29 = vpop.eup %1415 }
 0x112   :  { %v1418_v31 = vpop.eup %1417 }
 0x113   :  { %v204_v32 = vcombine.low %v1416_v29, %v1418_v31  ;;  %v312_v29 = vrot.slane %v307_v28, %v1591_v39  ;;  %v316_v31 = vrot.slane %v307_v28, %v1596_v41 }
 0x115   :  { %v211_v33 = vrot.slane %v204_v32, %v1606_v30 }
 0x117   :  { %v218_v35 = vrot.slane %v211_v33, %v1606_v30 }
 0x119   :  { %v220_v36 = vmul.f32 %v218_v35, %v197_v34 }
 0x11b   :  { %v226_v37 = vrot.slane %v220_v36, %v1591_v39  ;;  %v230_v40 = vrot.slane %v220_v36, %v1596_v41 }
 0x11d   :  { %v233_v42 = vmul.f32 %v226_v37, %v187_v11  ;;  %v234_v43 = vmul.f32 %v230_v40, %v188_v17  ;;  %v255_v49 = vmul.f32 %v230_v40, %v160_v52  ;;  %v254_v51 = vmul.f32 %v226_v37, %v1600_v47  ;;  %v1351_v47 = vld [vmem:[#allocation4 + $0x70] ss:$8 sps:$4 sm:$0xff]   ;;  %v1372_v11 = vld [vmem:[#allocation4] ss:$8 sps:$4 sm:$0xff]  }
 0x11e   :  { %841 = vmatpush1.bf16.msra.mxu0 %v1351_v47  ;;  %v1381_v17 = vld [vmem:[#allocation4 + $0xd0] ss:$8 sps:$4 sm:$0xff]  }
 0x11f   :  { %v237_v44 = vcombine.low %v233_v42, %v234_v43  ;;  %842 = vmatprep.subr.bf16.mxu0 %v1356_v62 }
 0x121   :  { %v244_v38 = vrot.slane %v237_v44, %v1606_v30 }
 0x122   :  { %843 = vmatpush1.bf16.msra.mxu0 %v1354_v63 }
 0x123   :  { %v251_v46 = vrot.slane %v244_v38, %v1606_v30  ;;  %844 = vmatprep.subr.bf16.mxu0 %v1359_v0 }
 0x125   :  { %v253_v48 = vsub.f32 %v221_v45, %v251_v46 }
 0x126   :  { %845 = vmatpush1.bf16.msra.mxu0 %v1357_v1 }
 0x127   :  { %v264_v50 = vrot.slane %v253_v48, %v1596_v41  ;;  %v260_v53 = vrot.slane %v253_v48, %v1591_v39  ;;  %846 = vmatprep.subr.bf16.mxu0 %v1362_v2 }
 0x129   :  { %v268_v56 = vadd.f32 %v264_v50, %v255_v49  ;;  %v267_v57 = vadd.f32 %v260_v53, %v254_v51 }
 0x12a   :  { %847 = vmatpush1.bf16.msra.mxu0 %v1360_v3 }
 0x12b   :  { %v272_v58 = vmul.f32 %v270_v54, %v268_v56  ;;  %v271_v59 = vmul.f32 %v269_v55, %v267_v57  ;;  %848 = vmatprep.subr.bf16.mxu0 %v1365_v4 }
 0x12d   :  { %v274_v60 = vpack.c.bf16 %v272_v58, %v272_v58  ;;  %v273_v52 = vpack.c.bf16 %v271_v59, %v271_v59 }
 0x12e   :  { %849 = vmatpush1.bf16.msra.mxu0 %v1363_v5 }
 0x12f   :  { %511 = vmatprep.mubr.bf16.mxu1 %v274_v60  ;;  %850 = vmatprep.subr.bf16.mxu0 %v1368_v6 }
 0x130   :  { %512 = vmatmul.mubr.bf16.vlgmr.msra.gmra.mxu1 %v273_v52 }
 0x132   :  { %851 = vmatpush1.bf16.msra.mxu0 %v1366_v7 }
 0x133   :  { %852 = vmatprep.subr.bf16.mxu0 %v1371_v9 }
 0x136   :  { %853 = vmatpush1.bf16.msra.mxu0 %v1369_v8 }
 0x137   :  { %854 = vmatprep.subr.bf16.mxu0 %v1374_v10 }
 0x13a   :  { %855 = vmatpush1.bf16.msra.mxu0 %v1372_v11 }
 0x13b   :  { %856 = vmatprep.subr.bf16.mxu0 %v1377_v12 }
 0x13e   :  { %857 = vmatpush2.bf16.msra.mxu0 %v1375_v13 }
 0x13f   :  { %858 = vmatprep.subr.bf16.mxu0 %v1380_v14 }
 0x142   :  { %859 = vmatpush2.bf16.msra.mxu0 %v1378_v15 }
 0x143   :  { %860 = vmatprep.subr.bf16.mxu0 %v1383_v16 }
 0x146   :  { %861 = vmatpush2.bf16.msra.mxu0 %v1381_v17 }
 0x147   :  { %862 = vmatprep.subr.bf16.mxu0 %v1386_v18 }
 0x14a   :  { %863 = vmatpush2.bf16.msra.mxu0 %v1384_v19 }
 0x14b   :  { %864 = vmatprep.subr.bf16.mxu0 %v1389_v20  ;;  %v558_v20 = vld [vmem:[%s1757_s10] sm:$0x3] }
 0x14e   :  { %865 = vmatpush2.bf16.msra.mxu0 %v1387_v21 }
 0x14f   :  { %866 = vmatprep.subr.bf16.mxu0 %v1392_v22 }
 0x152   :  { %867 = vmatpush2.bf16.msra.mxu0 %v1390_v23 }
 0x153   :  { %868 = vmatprep.subr.bf16.mxu0 %v1395_v24 }
 0x156   :  { %869 = vmatpush2.bf16.msra.mxu0 %v1393_v25 }
 0x157   :  { %870 = vmatprep.subr.bf16.mxu0 %v1398_v26 }
 0x15a   :  { %871 = vmatpush2.bf16.msra.mxu0 %v1396_v27 }
 0x1f0   :  { %v513_v32 = vpop.f32.mrf.mxu1 }
 0x1f1   :  { %v514_v33 = vadd.f32 %v513_v32, %v312_v29  ;;  %v582_v29 = vld [vmem:[%s1758_s11] sm:$0x3] }
 0x1f2   :  { %v515_v34 = vpop.f32.mrf.mxu1 }
 0x1f3   :  { %v1634_v35 = vmax.f32 %v514_v33, 0.0  ;;  %v516_v36 = vadd.f32 %v515_v34, %v316_v31 }
 0x1f4   :  { %v517_v37 = vpop.f32.mrf.mxu1 }
 0x1f5   :  { %v522_v40 = vrot.slane %v1634_v35, 4  ;;  %v534_v42 = vmul.f32 %v1634_v35, %v1634_v35  ;;  %v521_v43 = vmax.f32 %v516_v36, 0.0 }
 0x1f6   :  { %v518_v44 = vpop.f32.mrf.mxu1 }
 0x1f7   :  { %v523_v38 = vadd.f32 %v522_v40, %v1634_v35  ;;  %v536_v45 = vrot.slane %v534_v42, 4  ;;  %v528_v46 = vrot.slane %v521_v43, 4  ;;  %v535_v48 = vmul.f32 %v521_v43, %v521_v43  ;;  %v631_v40 = vld [vmem:[%s1773_s26 + $0x8] sm:$0xff] }
 0x1f9   :  { %v524_v49 = vrot.slane %v523_v38, 2  ;;  %v537_v50 = vadd.f32 %v536_v45, %v534_v42  ;;  %v529_v51 = vadd.f32 %v528_v46, %v521_v43  ;;  %v542_v53 = vrot.slane %v535_v48, 4  ;;  %v630_v42 = vld [vmem:[%s1773_s26] sm:$0xff] }
 0x1fb   :  { %v525_v54 = vadd.f32 %v524_v49, %v523_v38  ;;  %v538_v55 = vrot.slane %v537_v50, 2  ;;  %v530_v56 = vrot.slane %v529_v51, 2  ;;  %v543_v57 = vadd.f32 %v542_v53, %v535_v48  ;;  %v1400_v49 = vld [vmem:[%s1763_s16 + $0x38] sm:$0xff]   ;;  %v1403_v53 = vld [vmem:[%s1763_s16 + $0x68] sm:$0xff]  }
 0x1fd   :  { %v526_v58 = vrot.slane %v525_v54, 1  ;;  %v539_v59 = vadd.f32 %v538_v55, %v537_v50  ;;  %v531_v60 = vadd.f32 %v530_v56, %v529_v51  ;;  %v544_v52 = vrot.slane %v543_v57, 2  ;;  %v1401_v50 = vld [vmem:[%s1763_s16 + $0x70] sm:$0xff]   ;;  %v1405_v55 = vld [vmem:[%s1763_s16 + $0x60] sm:$0xff]  }
 0x1fe   :  { %v1402_v51 = vld [vmem:[%s1763_s16 + $0x30] sm:$0xff]   ;;  %v1406_v56 = vld [vmem:[%s1763_s16 + $0x20] sm:$0xff]  }
 0x1ff   :  { %v527_v61 = vadd.f32 %v526_v58, %v525_v54  ;;  %v540_v47 = vrot.slane %v539_v59, 1  ;;  %v532_v62 = vrot.slane %v531_v60, 1  ;;  %v545_v63 = vadd.f32 %v544_v52, %v543_v57  ;;  %v1404_v54 = vld [vmem:[%s1763_s16 + $0x28] sm:$0xff]   ;;  %v1407_v57 = vld [vmem:[%s1763_s16 + $0x58] sm:$0xff]  }
 0x200   :  { %v1408_v58 = vld [vmem:[%s1763_s16 + $0x18] sm:$0xff]   ;;  %v1411_v52 = vld [vmem:[%s1763_s16 + $0x48] sm:$0xff]  }
 0x201   :  { %v541_v0 = vadd.f32 %v540_v47, %v539_v59  ;;  %v548_v1 = vmul.f32 0.125, %v527_v61  ;;  %v533_v2 = vadd.f32 %v532_v62, %v531_v60  ;;  %v546_v3 = vrot.slane %v545_v63, 1  ;;  %v1409_v59 = vld [vmem:[%s1763_s16 + $0x50] sm:$0xff]   ;;  %v1412_v61 = vld [vmem:[%s1763_s16 + $0x8] sm:$0xff]   ;;  %v1413_v47 = vld [vmem:[%s1763_s16 + $0x40] sm:$0xff]  }
 0x202   :  { %v1410_v60 = vld [vmem:[%s1763_s16 + $0x10] sm:$0xff]   ;;  %v1414_v62 = vld [vmem:[%s1763_s16] sm:$0xff]  }
 0x203   :  { %v550_v4 = vmul.f32 0.125, %v541_v0  ;;  %v552_v5 = vmul.f32 %v548_v1, %v548_v1  ;;  %v547_v6 = vadd.f32 %v546_v3, %v545_v63  ;;  %v549_v7 = vmul.f32 0.125, %v533_v2  ;;  %v668_v63 = vld [vmem:[%s1760_s13] sm:$0x3] }
 0x204   :  { %v673_v0 = vrot.slane %v668_v63, %v1591_v39 }
 0x205   :  { %v554_v8 = vsub.f32 %v550_v4, %v552_v5  ;;  %v551_v9 = vmul.f32 0.125, %v547_v6  ;;  %v553_v10 = vmul.f32 %v549_v7, %v549_v7 }
 0x207   :  { %v556_v11 = vmax.f32 %v554_v8, 0.0  ;;  %v555_v12 = vsub.f32 %v551_v9, %v553_v10 }
 0x209   :  { %v559_v13 = vadd.f32 1e-05, %v556_v11  ;;  %v557_v14 = vmax.f32 %v555_v12, 0.0 }
 0x20b   :  { %v560_v15 = vadd.f32 1e-05, %v557_v14  ;;  %1419 = vrsqrt.f32 %v559_v13 }
 0x20d   :  { %1421 = vrsqrt.f32 %v560_v15 }
 0x218   :  { %v1420_v16 = vpop.eup %1419 }
 0x21a   :  { %v1422_v17 = vpop.eup %1421 }
 0x21b   :  { %v565_v18 = vcombine.low %v1420_v16, %v1422_v17 }
 0x21d   :  { %v572_v19 = vrot.slane %v565_v18, %v1606_v30 }
 0x21f   :  { %v579_v21 = vrot.slane %v572_v19, %v1606_v30 }
 0x221   :  { %v581_v22 = vmul.f32 %v579_v21, %v558_v20 }
 0x223   :  { %v587_v23 = vrot.slane %v581_v22, %v1591_v39  ;;  %v591_v24 = vrot.slane %v581_v22, %v1596_v41 }
 0x225   :  { %v594_v25 = vmul.f32 %v587_v23, %v548_v1  ;;  %v595_v26 = vmul.f32 %v591_v24, %v549_v7  ;;  %v616_v33 = vmul.f32 %v591_v24, %v521_v43  ;;  %v615_v36 = vmul.f32 %v587_v23, %v1634_v35  ;;  %v1399_v35 = vld [vmem:[%s1763_s16 + $0x78] sm:$0xff]  }
 0x226   :  { %1272 = vmatprep.subr.bf16.mxu1 %v1399_v35  ;;  %v677_v1 = vrot.slane %v668_v63, %v1596_v41 }
 0x227   :  { %v598_v27 = vcombine.low %v594_v25, %v595_v26  ;;  %1273 = vmatpush3.bf16.msra.mxu1 %v1400_v49 }
 0x228   :  { %1274 = vmatprep.subr.bf16.mxu1 %v1401_v50 }
 0x229   :  { %v605_v28 = vrot.slane %v598_v27, %v1606_v30 }
 0x22b   :  { %v612_v31 = vrot.slane %v605_v28, %v1606_v30  ;;  %1275 = vmatpush3.bf16.msra.mxu1 %v1402_v51 }
 0x22c   :  { %1276 = vmatprep.subr.bf16.mxu1 %v1403_v53 }
 0x22d   :  { %v614_v32 = vsub.f32 %v582_v29, %v612_v31 }
 0x22f   :  { %v625_v34 = vrot.slane %v614_v32, %v1596_v41  ;;  %v621_v37 = vrot.slane %v614_v32, %v1591_v39  ;;  %1277 = vmatpush3.bf16.msra.mxu1 %v1404_v54 }
 0x230   :  { %1278 = vmatprep.subr.bf16.mxu1 %v1405_v55 }
 0x231   :  { %v629_v44 = vadd.f32 %v625_v34, %v616_v33  ;;  %v628_v38 = vadd.f32 %v621_v37, %v615_v36 }
 0x233   :  { %v633_v45 = vmul.f32 %v631_v40, %v629_v44  ;;  %v632_v46 = vmul.f32 %v630_v42, %v628_v38  ;;  %1279 = vmatpush3.bf16.msra.mxu1 %v1406_v56 }
 0x234   :  { %1280 = vmatprep.subr.bf16.mxu1 %v1407_v57  ;;  %v919_v57 = vld [vmem:[%s1761_s14] sm:$0x3] }
 0x235   :  { %v635_v48 = vpack.c.bf16 %v633_v45, %v633_v45  ;;  %v634_v43 = vpack.c.bf16 %v632_v46, %v632_v46 }
 0x237   :  { %872 = vmatprep.mubr.bf16.mxu0 %v635_v48  ;;  %1281 = vmatpush3.bf16.msra.mxu1 %v1408_v58 }
 0x238   :  { %873 = vmatmul.mubr.bf16.vlgmr.msra.gmra.mxu0 %v634_v43  ;;  %1282 = vmatprep.subr.bf16.mxu1 %v1409_v59 }
 0x23b   :  { %1283 = vmatpush3.bf16.msra.mxu1 %v1410_v60 }
 0x23c   :  { %1284 = vmatprep.subr.bf16.mxu1 %v1411_v52 }
 0x23f   :  { %1285 = vmatpush3.bf16.msra.mxu1 %v1412_v61 }
 0x240   :  { %1286 = vmatprep.subr.bf16.mxu1 %v1413_v47 }
 0x243   :  { %1287 = vmatpush3.bf16.msra.mxu1 %v1414_v62 }
 0x2f8   :  { %v874_v2 = vpop.f32.mrf.mxu0 }
 0x2f9   :  { %v875_v3 = vadd.f32 %v874_v2, %v673_v0  ;;  %v943_v0 = vld [vmem:[%s1762_s15] sm:$0x3] }
 0x2fa   :  { %v876_v4 = vpop.f32.mrf.mxu0 }
 0x2fb   :  { %v1714_v5 = vmax.f32 %v875_v3, 0.0  ;;  %v877_v6 = vadd.f32 %v876_v4, %v677_v1 }
 0x2fc   :  { %v878_v7 = vpop.f32.mrf.mxu0 }
 0x2fd   :  { %v883_v8 = vrot.slane %v1714_v5, 4  ;;  %v895_v9 = vmul.f32 %v1714_v5, %v1714_v5  ;;  %v882_v10 = vmax.f32 %v877_v6, 0.0 }
 0x2fe   :  { %v879_v11 = vpop.f32.mrf.mxu0 }
 0x2ff   :  { %v884_v12 = vadd.f32 %v883_v8, %v1714_v5  ;;  %v897_v13 = vrot.slane %v895_v9, 4  ;;  %v889_v14 = vrot.slane %v882_v10, 4  ;;  %v896_v15 = vmul.f32 %v882_v10, %v882_v10  ;;  %v992_v8 = vld [vmem:[%s1750_s3 + $0x8] sm:$0xff] }
 0x301   :  { %v885_v16 = vrot.slane %v884_v12, 2  ;;  %v898_v17 = vadd.f32 %v897_v13, %v895_v9  ;;  %v890_v18 = vadd.f32 %v889_v14, %v882_v10  ;;  %v903_v19 = vrot.slane %v896_v15, 4  ;;  %v991_v9 = vld [vmem:[%s1750_s3] sm:$0xff] }
 0x303   :  { %v886_v20 = vadd.f32 %v885_v16, %v884_v12  ;;  %v899_v21 = vrot.slane %v898_v17, 2  ;;  %v891_v22 = vrot.slane %v890_v18, 2  ;;  %v904_v23 = vadd.f32 %v903_v19, %v896_v15 }
 0x305   :  { %v887_v24 = vrot.slane %v886_v20, 1  ;;  %v900_v25 = vadd.f32 %v899_v21, %v898_v17  ;;  %v892_v26 = vadd.f32 %v891_v22, %v890_v18  ;;  %v905_v27 = vrot.slane %v904_v23, 2 }
 0x307   :  { %v888_v28 = vadd.f32 %v887_v24, %v886_v20  ;;  %v901_v29 = vrot.slane %v900_v25, 1  ;;  %v893_v31 = vrot.slane %v892_v26, 1  ;;  %v906_v32 = vadd.f32 %v905_v27, %v904_v23 }
 0x309   :  { %v902_v33 = vadd.f32 %v901_v29, %v900_v25  ;;  %v909_v34 = vmul.f32 0.125, %v888_v28  ;;  %v894_v36 = vadd.f32 %v893_v31, %v892_v26  ;;  %v907_v37 = vrot.slane %v906_v32, 1 }
 0x30b   :  { %v911_v40 = vmul.f32 0.125, %v902_v33  ;;  %v913_v42 = vmul.f32 %v909_v34, %v909_v34  ;;  %v908_v44 = vadd.f32 %v907_v37, %v906_v32  ;;  %v910_v38 = vmul.f32 0.125, %v894_v36 }
 0x30d   :  { %v915_v45 = vsub.f32 %v911_v40, %v913_v42  ;;  %v912_v46 = vmul.f32 0.125, %v908_v44  ;;  %v914_v48 = vmul.f32 %v910_v38, %v910_v38 }
 0x30f   :  { %v917_v43 = vmax.f32 %v915_v45, 0.0  ;;  %v916_v35 = vsub.f32 %v912_v46, %v914_v48 }
 0x311   :  { %v920_v49 = vadd.f32 1e-05, %v917_v43  ;;  %v918_v50 = vmax.f32 %v916_v35, 0.0 }
 0x313   :  { %v921_v51 = vadd.f32 1e-05, %v918_v50  ;;  %1423 = vrsqrt.f32 %v920_v49 }
 0x315   :  { %1425 = vrsqrt.f32 %v921_v51 }
 0x320   :  { %v1424_v53 = vpop.eup %1423 }
 0x322   :  { %v1426_v54 = vpop.eup %1425 }
 0x323   :  { %v926_v55 = vcombine.low %v1424_v53, %v1426_v54 }
 0x325   :  { %v933_v56 = vrot.slane %v926_v55, %v1606_v30 }
 0x327   :  { %v940_v58 = vrot.slane %v933_v56, %v1606_v30 }
 0x329   :  { %v942_v59 = vmul.f32 %v940_v58, %v919_v57 }
 0x32b   :  { %v948_v60 = vrot.slane %v942_v59, %v1591_v39  ;;  %v952_v52 = vrot.slane %v942_v59, %v1596_v41 }
 0x32d   :  { %v955_v61 = vmul.f32 %v948_v60, %v909_v34  ;;  %v956_v47 = vmul.f32 %v952_v52, %v910_v38  ;;  %v977_v3 = vmul.f32 %v952_v52, %v882_v10  ;;  %v976_v6 = vmul.f32 %v948_v60, %v1714_v5 }
 0x32f   :  { %v959_v62 = vcombine.low %v955_v61, %v956_v47 }
 0x331   :  { %v966_v63 = vrot.slane %v959_v62, %v1606_v30 }
 0x333   :  { %v973_v1 = vrot.slane %v966_v63, %v1606_v30 }
 0x335   :  { %v975_v2 = vsub.f32 %v943_v0, %v973_v1 }
 0x337   :  { %v986_v4 = vrot.slane %v975_v2, %v1596_v41  ;;  %v982_v7 = vrot.slane %v975_v2, %v1591_v39  ;;  %v1255_v39 = vld [vmem:[%s1764_s17] ss:$0 sm:$0xff] }
 0x339   :  { %v990_v11 = vadd.f32 %v986_v4, %v977_v3  ;;  %v989_v12 = vadd.f32 %v982_v7, %v976_v6 }
 0x33b   :  { %v994_v13 = vmul.f32 %v992_v8, %v990_v11  ;;  %v993_v30 = vmul.f32 %v991_v9, %v989_v12 }
 0x33d   :  { %v996_v14 = vpack.c.bf16 %v994_v13, %v994_v13  ;;  %v995_v10 = vpack.c.bf16 %v993_v30, %v993_v30 }
 0x33f   :  { %1164 = vmatprep.mubr.bf16.mxu1 %v996_v14 }
 0x340   :  { %1165 = vmatmul.mubr.bf16.vlgmr.msra.gmra.mxu1 %v995_v10 }
 0x400   :  { %v1288_v41 = vpop.f32.mrf.mxu1 }
 0x402   :  { %v1289_v5 = vpop.f32.mrf.mxu1 }
 0x403   :  { %v1290_v15 = vadd.f32 %v1289_v5, %v1288_v41 }
 0x404   :  { %v1291_v16 = vpop.f32.mrf.mxu1 }
 0x405   :  { %v1167_v17 = vadd.f32 %v1290_v15, %v1255_v39 }
 0x406   :  { %v1292_v18 = vpop.f32.mrf.mxu1 }
 0x407   :  { %1172 = vmax.xlane.f32.xlu0 %v1167_v17 }
 0x490   :  { %v1173_v19 = vpop.xlane.xlu0 %1172 }
 0x491   :  { %v1174_v20 = vsub.f32 %v1167_v17, %v1173_v19 }
 0x493   :  { %v1175_v21 = vmul.f32 1.442695, %v1174_v20 }
 0x495   :  { %1427 = vpow2.f32 %v1175_v21 }
 0x4a2   :  { %v1428_v22 = vpop.eup %1427 }
 0x4a3   :  { %1177 = vadd.xlane.f32.xlu0 %v1428_v22 }
 0x52c   :  { %v1178_v23 = vpop.xlane.xlu0 %1177 }
 0x52d   :  { %1429 = vrcp.f32 %v1178_v23 }
 0x53a   :  { %v1430_v24 = vpop.eup %1429 }
 0x53b   :  { %v1180_v25 = vmul.f32 %v1430_v24, %v1428_v22 }
 0x53d   :  { %1181 = vst [vmem:[%s1765_s18] sm:$0xff] %v1180_v25 }
 0x53e   :  { %1186 = vsyncpa [#allocation3], 1 }
 0x53f   :  { %1187 = vsyncpa [#allocation5], 1 }

</bundles_post_ra>
